<compile_context>
chip_gen: v7x
topology: tpu7x:2x2x1
jax: 0.10.0
libtpu: 0.0.40
codegen_flags: <defaults>
</compile_context>

<pallas_src>
import jax
import jax.numpy as jnp
import numpy as np
from jax import lax
from jax.experimental import pallas as pl
from jax.experimental.pallas import tpu as pltpu


# ============================================================================
# small helpers
# ============================================================================
def _rup8(n):
    return ((n + 7) // 8) * 8


def _k3_offsets(Hp, Wp):
    return tuple(kd * Hp * Wp + kh * Wp + kw
                 for kd in range(3) for kh in range(3) for kw in range(3))


def _k2_offsets(Hp, Wp):
    return tuple(kd * Hp * Wp + kh * Wp + kw
                 for kd in (0, 1) for kh in (0, 1) for kw in (0, 1))


def _interior_mask(B, Dp, Hp, Wp):
    m = np.zeros((Dp, Hp, Wp), np.float32)
    m[1:-1, 1:-1, 1:-1] = 1.0
    m = np.ascontiguousarray(np.broadcast_to(m[None], (B, Dp, Hp, Wp)))
    return jnp.asarray(m.reshape(1, B * Dp * Hp * Wp))


def _valid_mask_k2(B, Dq, Hq, Wq):
    m = np.zeros((Dq, Hq, Wq), np.float32)
    m[:-1, :-1, :-1] = 1.0
    m = np.ascontiguousarray(np.broadcast_to(m[None], (B, Dq, Hq, Wq)))
    return jnp.asarray(m.reshape(1, B * Dq * Hq * Wq))


def _pcall(kernel, args, out_shapes, scratch_shapes=()):
    def spec(shape):
        return pl.BlockSpec(shape, lambda i, n=len(shape): (0,) * n)

    in_specs = [spec(a.shape) for a in args]
    if isinstance(out_shapes, (tuple, list)):
        out_shape = tuple(out_shapes)
        out_specs = tuple(spec(s.shape) for s in out_shape)
    else:
        out_shape = out_shapes
        out_specs = spec(out_shapes.shape)
    return pl.pallas_call(
        kernel,
        out_shape=out_shape,
        grid=(1,),
        in_specs=in_specs,
        out_specs=out_specs,
        scratch_shapes=list(scratch_shapes),
        compiler_params=pltpu.CompilerParams(dimension_semantics=("arbitrary",)),
    )(*args)


# ============================================================================
# Fused conv kernel: im2col stack in VMEM scratch + one MXU dot per conv,
# optional fused ResBlocks and ReLU / ring-mask epilogues.
# ============================================================================
def _make_conv_kernel(c_ins, c_pads, c_out, res_mids, offs, lo, Lm, Lp,
                      relu_in, final_relu, use_mask):
    """Kernel refs: [x_i...] (+mask) w_in b_in [w1 b1 w2 b2]*res out | xst (hbuf)."""
    T = len(offs)
    nin = len(c_ins)
    n_res = len(res_mids)

    def kern(*refs):
        it = iter(refs)
        x_refs = [next(it) for _ in range(nin)]
        mask_ref = next(it) if use_mask else None
        w_in_ref = next(it)
        b_in_ref = next(it)
        res_refs = [(next(it), next(it), next(it), next(it)) for _ in range(n_res)]
        out_ref = next(it)
        xst_ref = next(it)
        hbuf_ref = next(it) if n_res else None

        mask = mask_ref[:, lo:lo + Lm] if use_mask else None

        # padded-channel rows of the stack must be zero (never 0 * garbage)
        xst_ref[...] = jnp.zeros(xst_ref.shape, xst_ref.dtype)

        # ---- conv_in: stack every tap of every input (VMEM-only im2col),
        #      then a single large-K MXU matmul with fused bias (+ReLU).
        base = 0
        for xr, C, Cp in zip(x_refs, c_ins, c_pads):
            for t, off in enumerate(offs):
                xst_ref[base + t * Cp: base + t * Cp + C, :] = xr[:, off:off + Lm]
            base += T * Cp
        h = jnp.dot(w_in_ref[...], xst_ref[0:base, :],
                    preferred_element_type=jnp.float32) + b_in_ref[...]
        if relu_in:
            h = jnp.maximum(h, 0.0)

        # ---- fused ResBlocks: h += conv1(relu(conv3(relu(h))))
        for (w1_ref, b1_ref, w2_ref, b2_ref), _cmid in zip(res_refs, res_mids):
            hb = jnp.maximum(h, 0.0)            # pre-ReLU hoisted out of tap loop
            if use_mask:
                hb = hb * mask                  # zero the padding ring before taps
            if lo > 0:
                hbuf_ref[:, :lo] = jnp.zeros((c_out, lo), hbuf_ref.dtype)
            if Lp - lo - Lm > 0:
                hbuf_ref[:, lo + Lm:] = jnp.zeros((c_out, Lp - lo - Lm),
                                                  hbuf_ref.dtype)
            hbuf_ref[:, lo:lo + Lm] = hb.astype(hbuf_ref.dtype)
            for t, off in enumerate(offs):
                xst_ref[t * c_out:(t + 1) * c_out, :] = hbuf_ref[:, off:off + Lm]
            mid = jnp.dot(w1_ref[...], xst_ref[0:T * c_out, :],
                          preferred_element_type=jnp.float32) + b1_ref[...]
            mid = jnp.maximum(mid, 0.0)
            h = h + jnp.dot(w2_ref[...], mid.astype(jnp.bfloat16),
                            preferred_element_type=jnp.float32) + b2_ref[...]

        if final_relu:
            h = jnp.maximum(h, 0.0)
        if use_mask:
            h = h * mask
        if lo > 0:
            out_ref[:, :lo] = jnp.zeros((c_out, lo), out_ref.dtype)
        if Lp - lo - Lm > 0:
            out_ref[:, lo + Lm:] = jnp.zeros((c_out, Lp - lo - Lm), out_ref.dtype)
        out_ref[:, lo:lo + Lm] = h.astype(out_ref.dtype)

    return kern


# ============================================================================
# Fused 1x1 quantize_conv + vector quantizer kernel
# ============================================================================
def _make_vq_kernel(nin, K):
    def kern(*refs):
        it = iter(refs)
        x_refs = [next(it) for _ in range(nin)]
        mask_ref = next(it)
        w_refs = [next(it) for _ in range(nin)]
        b_ref = next(it)
        embT_ref = next(it)     # (K, De)
        emb_ref = next(it)      # (De, K)
        e2_ref = next(it)       # (K, 1)
        q_ref = next(it)
        idx_ref = next(it)
        sse_ref = next(it)

        z = b_ref[...]
        for i in range(nin):
            z = z + jnp.dot(w_refs[i][...], x_refs[i][...].astype(jnp.float32),
                            preferred_element_type=jnp.float32)
        # |z|^2 term omitted (argmin-invariant)
        dist = e2_ref[...] - 2.0 * jnp.dot(embT_ref[...], z,
                                           preferred_element_type=jnp.float32)
        mind = jnp.min(dist, axis=0, keepdims=True)
        kio = lax.broadcasted_iota(jnp.int32, dist.shape, 0)
        idx = jnp.min(jnp.where(dist == mind, kio, K), axis=0, keepdims=True)
        idx = jnp.minimum(idx, K - 1)                    # ties -> lowest, NaN-safe
        onehot = (kio == idx).astype(jnp.float32)
        quant = jnp.dot(emb_ref[...], onehot, preferred_element_type=jnp.float32)
        m = mask_ref[...]
        q_ref[...] = quant * m                           # ring-zeroed slab output
        idx_ref[...] = idx
        sse_ref[...] = jnp.sum((quant - z) ** 2, axis=0, keepdims=True) * m

    return kern


# ============================================================================
# Module-level wrappers (layout glue only; all FLOPs live in the kernels)
# All activations between kernels are channel-major zero-ring slabs
#   (C, B, D+2, H+2, W+2)  == valid volume padded by 1 with a zero ring.
# ============================================================================
def run_stage(slabs, p, final_relu=True):
    """Fused [Conv3d(k=3,p=1) -> n x ResBlock -> ReLU] on same-geometry slabs."""
    c_ins = tuple(int(s.shape[0]) for s in slabs)
    _, B, Dp, Hp, Wp = slabs[0].shape
    Lp = B * Dp * Hp * Wp
    offs = _k3_offsets(Hp, Wp)
    delta = Hp * Wp + Wp + 1
    Lm = Lp - 2 * delta
    c_out = int(p["b_in"].shape[0])
    res_mids = tuple(int(rp["b1"].shape[0]) for rp in p["res"])
    c_pads = tuple(_rup8(c) for c in c_ins)
    mask = _interior_mask(B, Dp, Hp, Wp)

    args = [s.reshape(s.shape[0], Lp).astype(jnp.bfloat16) for s in slabs]
    args += [mask, p["w_in"], p["b_in"]]
    for rp in p["res"]:
        args += [rp["w1"], rp["b1"], rp["w2"], rp["b2"]]

    maxrows = max(27 * sum(c_pads), 27 * c_out)
    scratch = [pltpu.VMEM((maxrows, Lm), jnp.bfloat16)]
    if res_mids:
        scratch.append(pltpu.VMEM((c_out, Lp), jnp.bfloat16))
    kern = _make_conv_kernel(c_ins, c_pads, c_out, res_mids, offs, delta, Lm, Lp,
                             relu_in=False, final_relu=final_relu, use_mask=True)
    out = _pcall(kern, args, jax.ShapeDtypeStruct((c_out, Lp), jnp.bfloat16), scratch)
    return out.reshape(c_out, B, Dp, Hp, Wp)


def run_conv_s2(slab, p, relu=True):
    """Conv3d(k=4, s=2, p=1) (+ReLU) on a zero-ring slab.
    Lowered to space-to-depth (XLA) + a stride-1 k=2 implicit-GEMM kernel.
    Returns the downsampled volume as a fresh zero-ring slab."""
    C, B, Dp, Hp, Wp = slab.shape
    Dq, Hq, Wq = Dp // 2, Hp // 2, Wp // 2
    xq = slab.reshape(C, B, Dq, 2, Hq, 2, Wq, 2).transpose(0, 3, 5, 7, 1, 2, 4, 6)
    Lp = B * Dq * Hq * Wq
    xq = xq.reshape(C * 8, Lp).astype(jnp.bfloat16)
    offs = _k2_offsets(Hq, Wq)
    Lm = Lp - offs[-1]
    mask = _valid_mask_k2(B, Dq, Hq, Wq)
    c_out = int(p["b"].shape[0])
    kern = _make_conv_kernel((C * 8,), (C * 8,), c_out, (), offs, 0, Lm, Lp,
                             relu_in=relu, final_relu=False, use_mask=True)
    scratch = [pltpu.VMEM((8 * C * 8, Lm), jnp.bfloat16)]
    out = _pcall(kern, [xq, mask, p["w"], p["b"]],
                 jax.ShapeDtypeStruct((c_out, Lp), jnp.bfloat16), scratch)
    out5 = out.reshape(c_out, B, Dq, Hq, Wq)
    # masked last index is already 0 -> one low-pad rebuilds the zero ring
    return jnp.pad(out5, ((0, 0), (0, 0), (1, 0), (1, 0), (1, 0)))


def run_convT(slab, p, relu=False):
    """ConvTranspose3d(k=4, s=2, p=1) (+ReLU) on a zero-ring slab.
    Sub-pixel decomposition: one stride-1 k=2 kernel producing 8 parity groups,
    interleaved to the 2x upsampled (unpadded, channel-major) volume in XLA."""
    C, B, Dp, Hp, Wp = slab.shape
    D, H, W = Dp - 2, Hp - 2, Wp - 2
    Lp = B * Dp * Hp * Wp
    offs = _k2_offsets(Hp, Wp)
    Lm = Lp - offs[-1]
    c8 = int(p["b"].shape[0])
    O = c8 // 8
    cpad = _rup8(C)
    kern = _make_conv_kernel((C,), (cpad,), c8, (), offs, 0, Lm, Lp,
                             relu_in=relu, final_relu=False, use_mask=False)
    scratch = [pltpu.VMEM((8 * cpad, Lm), jnp.bfloat16)]
    y = _pcall(kern, [slab.reshape(C, Lp).astype(jnp.bfloat16), p["w"], p["b"]],
               jax.ShapeDtypeStruct((c8, Lp), jnp.bfloat16), scratch)
    y8 = y.reshape(2, 2, 2, O, B, Dp, Hp, Wp)
    parts = [y8[pd, ph, pw, :, :, pd:pd + D, ph:ph + H, pw:pw + W]
             for pd in range(2) for ph in range(2) for pw in range(2)]
    z = jnp.stack(parts, 0).reshape(2, 2, 2, O, B, D, H, W)
    return z.transpose(3, 4, 5, 0, 6, 1, 7, 2).reshape(O, B, 2 * D, 2 * H, 2 * W)


def run_vq(slabs, qp, vp):
    """Fused 1x1 quantize_conv (multi-input, replaces the channel concat) + VQ."""
    _, B, Dp, Hp, Wp = slabs[0].shape
    D, H, W = Dp - 2, Hp - 2, Wp - 2
    Lp = B * Dp * Hp * Wp
    De = int(qp["b"].shape[0])
    K = int(vp["emb"].shape[1])
    mask = _interior_mask(B, Dp, Hp, Wp)
    args = [s.reshape(s.shape[0], Lp) for s in slabs] + [mask]
    args += list(qp["w"]) + [qp["b"], vp["embT"], vp["emb"], vp["e2"]]
    kern = _make_vq_kernel(len(slabs), K)
    q, idx, sse = _pcall(
        kern, args,
        (jax.ShapeDtypeStruct((De, Lp), jnp.float32),
         jax.ShapeDtypeStruct((1, Lp), jnp.int32),
         jax.ShapeDtypeStruct((1, Lp), jnp.float32)))
    diff = jnp.sum(sse) / float(B * D * H * W * De)
    quant_slab = q.reshape(De, B, Dp, Hp, Wp)
    ids = idx.reshape(B, Dp, Hp, Wp)[:, 1:1 + D, 1:1 + H, 1:1 + W]
    return diff, quant_slab, ids


# ============================================================================
# Parameters (synthetic, deterministic) pre-packed for the kernels
# ============================================================================
def _conv_raw(key, cout, cin, k):
    kw, kb = jax.random.split(key)
    w = jax.random.normal(kw, (cout, cin, k, k, k), jnp.float32) / np.sqrt(cin * k ** 3)
    b = 0.01 * jax.random.normal(kb, (cout,), jnp.float32)
    return w, b


def _pack_k_w(w, c_ins, c_pads):
    """(O, sum(c_ins), k,k,k) -> (O, k^3 * sum(c_pads)) bf16; taps folded into the
    contraction dim, per-input channel pitch padded to a sublane multiple."""
    O, k = w.shape[0], w.shape[2]
    cols, start = [], 0
    for Ci, Cp in zip(c_ins, c_pads):
        wi = jnp.transpose(w[:, start:start + Ci], (0, 2, 3, 4, 1))   # (O,k,k,k,Ci)
        if Cp > Ci:
            wi = jnp.pad(wi, ((0, 0), (0, 0), (0, 0), (0, 0), (0, Cp - Ci)))
        cols.append(wi.reshape(O, k ** 3 * Cp))
        start += Ci
    return jnp.concatenate(cols, axis=1).astype(jnp.bfloat16)


def stage_params(key, c_ins, c_out, n_res, c_res):
    keys = jax.random.split(key, 1 + 2 * max(n_res, 1))
    w, b = _conv_raw(keys[0], c_out, sum(c_ins), 3)
    c_pads = tuple(_rup8(c) for c in c_ins)
    p = {"w_in": _pack_k_w(w, c_ins, c_pads), "b_in": b.reshape(c_out, 1),
         "w_in_raw": w, "b_in_raw": b, "res": []}
    for i in range(n_res):
        w1, b1 = _conv_raw(keys[1 + 2 * i], c_res, c_out, 3)
        w2, b2 = _conv_raw(keys[2 + 2 * i], c_out, c_res, 1)
        p["res"].append({
            "w1": _pack_k_w(w1, (c_out,), (c_out,)), "b1": b1.reshape(c_res, 1),
            "w2": w2.reshape(c_out, c_res).astype(jnp.bfloat16),
            "b2": b2.reshape(c_out, 1),
            "w1_raw": w1, "b1_raw": b1, "w2_raw": w2, "b2_raw": b2})
    return p


def conv_s2_params(key, cin, cout):
    """Conv3d(k=4, s=2, p=1) weights pre-arranged for the space-to-depth path."""
    w, b = _conv_raw(key, cout, cin, 4)
    w8 = (w.reshape(cout, cin, 2, 2, 2, 2, 2, 2)      # (O,C,td,sd,th,sh,tw,sw)
            .transpose(0, 2, 4, 6, 1, 3, 5, 7)        # (O,td,th,tw,C,sd,sh,sw)
            .reshape(cout, 8 * cin * 8))
    return {"w": w8.astype(jnp.bfloat16), "b": b.reshape(cout, 1),
            "w_raw": w, "b_raw": b}


def convT_params(key, cin, cout):
    """ConvTranspose3d(k=4, s=2, p=1) weights for the sub-pixel parity path."""
    kw, kb = jax.random.split(key)
    w = jax.random.normal(kw, (cin, cout, 4, 4, 4), jnp.float32) / np.sqrt(cin * 64)
    b = 0.01 * jax.random.normal(kb, (cout,), jnp.float32)
    idx = np.array([[3, 1], [2, 0]])                   # kernel index per (parity, tap)
    wc = w[:, :, idx][:, :, :, :, idx][..., idx]       # (c,o,pd,td,ph,th,pw,tw)
    wp = jnp.transpose(wc, (2, 4, 6, 1, 3, 5, 7, 0))   # (pd,ph,pw,o,td,th,tw,c)
    cpad = _rup8(cin)
    if cpad > cin:
        wp = jnp.pad(wp, [(0, 0)] * 7 + [(0, cpad - cin)])
    wp = wp.reshape(8 * cout, 8 * cpad)
    return {"w": wp.astype(jnp.bfloat16), "b": jnp.tile(b, 8).reshape(8 * cout, 1),
            "w_raw": w, "b_raw": b}


def qconv_params(key, c_ins, de):
    w, b = _conv_raw(key, de, sum(c_ins), 1)
    w2 = w.reshape(de, sum(c_ins))
    ws, start = [], 0
    for Ci in c_ins:
        ws.append(w2[:, start:start + Ci])
        start += Ci
    return {"w": ws, "b": b.reshape(de, 1), "w_raw": w, "b_raw": b}


def vq_params(key, dim, n_embed):
    emb = jax.random.normal(key, (dim, n_embed), jnp.float32)
    return {"emb": emb, "embT": emb.T,
            "e2": jnp.sum(emb * emb, axis=0).reshape(n_embed, 1)}


class Params:
    filter = 8           # channel
    n_res_block = 1
    n_res_channel = 4
    z_size = 4           # embed_dim
    K = 16               # n_embed


def init_vqvae(key, hp):
    ch, ed, ne = hp.filter, hp.z_size, hp.K
    nrb, nrc = hp.n_res_block, hp.n_res_channel
    ks = jax.random.split(key, 15)
    m = {}
    m["enc_b"] = {"c1": conv_s2_params(ks[0], 1, ch // 2),
                  "c2": conv_s2_params(ks[1], ch // 2, ch),
                  "stage": stage_params(ks[2], (ch,), ch, nrb, nrc)}
    m["enc_t"] = {"c1": conv_s2_params(ks[3], ch, ch // 2),
                  "stage": stage_params(ks[4], (ch // 2,), ch, nrb, nrc)}
    m["qconv_t"] = qconv_params(ks[5], (ch,), ed)
    m["vq_t"] = vq_params(ks[6], ed, ne)
    m["dec_t"] = {"stage": stage_params(ks[7], (ed,), ch, nrb, nrc),
                  "up": convT_params(ks[8], ch, ed)}
    m["qconv_b"] = qconv_params(ks[9], (ed, ch), ed)     # cat order: [dec_t, enc_b]
    m["vq_b"] = vq_params(ks[10], ed, ne)
    m["upsample_t"] = convT_params(ks[11], ed, ed)
    m["dec"] = {"stage": stage_params(ks[12], (ed, ed), ch, nrb, nrc),  # [up_t, quant_b]
                "up1": convT_params(ks[13], ch, ch // 2),
                "up2": convT_params(ks[14], ch // 2, 1)}
    return m


# ============================================================================
# VQVAE forward (channel-major zero-ring slabs internally)
# ============================================================================
def vqvae_encode(m, x5):
    xp = jnp.pad(x5, ((0, 0), (0, 0), (1, 1), (1, 1), (1, 1)))
    h = run_conv_s2(xp, m["enc_b"]["c1"], relu=True)
    h = run_conv_s2(h, m["enc_b"]["c2"], relu=True)
    enc_b = run_stage([h], m["enc_b"]["stage"], final_relu=True)

    h = run_conv_s2(enc_b, m["enc_t"]["c1"], relu=True)
    enc_t = run_stage([h], m["enc_t"]["stage"], final_relu=True)

    diff_t, quant_t, id_t = run_vq([enc_t], m["qconv_t"], m["vq_t"])

    h = run_stage([quant_t], m["dec_t"]["stage"], final_relu=True)
    dec_t = run_convT(h, m["dec_t"]["up"], relu=False)
    dec_t_slab = jnp.pad(dec_t, ((0, 0), (0, 0), (1, 1), (1, 1), (1, 1)))

    diff_b, quant_b, id_b = run_vq([dec_t_slab, enc_b], m["qconv_b"], m["vq_b"])
    return quant_t, quant_b, diff_t + diff_b, id_t, id_b


def vqvae_decode(m, quant_t_slab, quant_b_slab):
    up_t = run_convT(quant_t_slab, m["upsample_t"], relu=False)
    up_t_slab = jnp.pad(up_t, ((0, 0), (0, 0), (1, 1), (1, 1), (1, 1)))
    h = run_stage([up_t_slab, quant_b_slab], m["dec"]["stage"], final_relu=True)
    h = run_convT(h, m["dec"]["up1"], relu=True)
    h = jnp.pad(h, ((0, 0), (0, 0), (1, 1), (1, 1), (1, 1)))
    return run_convT(h, m["dec"]["up2"], relu=False)


def vqvae_forward(m, x):
    """x: (B, C, D, H, W) NCDHW, like the PyTorch module."""
    x5 = x.transpose(1, 0, 2, 3, 4)
    quant_t, quant_b, diff, _, _ = vqvae_encode(m, x5)
    dec = vqvae_decode(m, quant_t, quant_b)
    dec = dec.transpose(1, 0, 2, 3, 4).astype(jnp.float32)
    qt = quant_t[:, :, 1:-1, 1:-1, 1:-1].transpose(1, 0, 2, 3, 4)
    qb = quant_b[:, :, 1:-1, 1:-1, 1:-1].transpose(1, 0, 2, 3, 4)
    return dec, (diff, qt, qb)


# ============================================================================
# Pure-JAX references (used only by the numeric self-checks in __main__)
# ============================================================================
def _ref_conv(x, w, b, stride=1, pad=1):
    out = lax.conv_general_dilated(
        x, w, (stride,) * 3, [(pad, pad)] * 3,
        dimension_numbers=("NCDHW", "OIDHW", "NCDHW"))
    return out + b.reshape(1, -1, 1, 1, 1)


def _ref_convT(x, w, b):
    wf = jnp.flip(w, axis=(2, 3, 4)).transpose(1, 0, 2, 3, 4)
    out = lax.conv_general_dilated(
        x, wf, (1, 1, 1), [(2, 2)] * 3, lhs_dilation=(2, 2, 2),
        dimension_numbers=("NCDHW", "OIDHW", "NCDHW"))
    return out + b.reshape(1, -1, 1, 1, 1)


def _ref_stage(x, sp, final_relu=True):
    h = _ref_conv(x, sp["w_in_raw"], sp["b_in_raw"], 1, 1)
    for rp in sp["res"]:
        t = _ref_conv(jax.nn.relu(h), rp["w1_raw"], rp["b1_raw"], 1, 1)
        t = _ref_conv(jax.nn.relu(t), rp["w2_raw"], rp["b2_raw"], 1, 0)
        h = h + t
    return jax.nn.relu(h) if final_relu else h


# ============================================================================
if __name__ == "__main__":
    root = jax.random.PRNGKey(0)
    k_params, k_input, k_t1, k_t2, k_t3, k_tx = jax.random.split(root, 6)

    def cm(t):      # NCDHW -> channel-major
        return t.transpose(1, 0, 2, 3, 4)

    def ncdhw(t):
        return t.transpose(1, 0, 2, 3, 4)

    # ---- numeric self-checks of the Pallas conv lowerings vs lax (bf16 vs f32)
    # 1) Conv3d(k=4, s=2, p=1) via space-to-depth
    x = jax.random.normal(k_tx, (2, 3, 6, 6, 6), jnp.float32)
    p = conv_s2_params(k_t1, 3, 8)
    slab = jnp.pad(cm(x), ((0, 0), (0, 0), (1, 1), (1, 1), (1, 1)))
    got = ncdhw(run_conv_s2(slab, p, relu=False)[:, :, 1:-1, 1:-1, 1:-1]).astype(jnp.float32)
    ref = _ref_conv(x, p["w_raw"], p["b_raw"], stride=2, pad=1)
    np.testing.assert_allclose(np.asarray(got), np.asarray(ref), atol=0.1, rtol=0.1)

    # 2) ConvTranspose3d(k=4, s=2, p=1) via sub-pixel parity decomposition
    p = convT_params(k_t2, 5, 3)
    x = jax.random.normal(k_tx, (2, 5, 3, 3, 3), jnp.float32)
    slab = jnp.pad(cm(x), ((0, 0), (0, 0), (1, 1), (1, 1), (1, 1)))
    got = ncdhw(run_convT(slab, p, relu=False)).astype(jnp.float32)
    ref = _ref_convT(x, p["w_raw"], p["b_raw"])
    np.testing.assert_allclose(np.asarray(got), np.asarray(ref), atol=0.1, rtol=0.1)

    # 3) fused stage: Conv3d(k=3, p=1) -> ResBlock -> ReLU
    sp = stage_params(k_t3, (4,), 8, 1, 4)
    x = jax.random.normal(k_tx, (2, 4, 4, 4, 4), jnp.float32)
    slab = jnp.pad(cm(x), ((0, 0), (0, 0), (1, 1), (1, 1), (1, 1)))
    got = ncdhw(run_stage([slab], sp, final_relu=True)[:, :, 1:-1, 1:-1, 1:-1]).astype(jnp.float32)
    ref = _ref_stage(x, sp, final_relu=True)
    np.testing.assert_allclose(np.asarray(got), np.asarray(ref), atol=0.1, rtol=0.1)

    # ---- full model forward
    hp = Params()
    model = init_vqvae(k_params, hp)
    x = jax.random.normal(k_input, (2, 1, 16, 16, 16), jnp.float32)

    fwd = jax.jit(vqvae_forward)
    dec, (diff, quant_t, quant_b) = fwd(model, x)
    jax.block_until_ready((dec, diff, quant_t, quant_b))

    assert dec.shape == (2, 1, 16, 16, 16), dec.shape
    assert quant_t.shape == (2, 4, 2, 2, 2), quant_t.shape
    assert quant_b.shape == (2, 4, 4, 4, 4), quant_b.shape
    assert diff.shape == (), diff.shape
    assert bool(jnp.isfinite(dec).all()) and bool(jnp.isfinite(diff))

    print("KERNEL_OK")
</pallas_src>

<mosaic_0001>
module attributes {stable_mosaic.version = 11 : i64} {
  func.func @kern(%arg0: i32, %arg1: memref<24x128xbf16, #tpu.memory_space<vmem>>, %arg2: memref<1x128xf32, #tpu.memory_space<vmem>>, %arg3: memref<8x192xbf16, #tpu.memory_space<vmem>>, %arg4: memref<8x1xf32, #tpu.memory_space<vmem>>, %arg5: memref<8x128xbf16, #tpu.memory_space<vmem>>, %arg6: memref<192x107xbf16, #tpu.memory_space<vmem>>) attributes {dimension_semantics = [#tpu.dimension_semantics<arbitrary>], iteration_bounds = array<i64: 1>, scalar_prefetch = 0 : i64, scratch_operands = 1 : i64, tpu.core_type = #tpu.core_type<tc>, window_params = [{pipeline_mode = #tpu.pipeline_mode<synchronous>, transform_indices = @transform_0, window_bounds = array<i64: 24, 128>}, {pipeline_mode = #tpu.pipeline_mode<synchronous>, transform_indices = @transform_1, window_bounds = array<i64: 1, 128>}, {pipeline_mode = #tpu.pipeline_mode<synchronous>, transform_indices = @transform_2, window_bounds = array<i64: 8, 192>}, {pipeline_mode = #tpu.pipeline_mode<synchronous>, transform_indices = @transform_3, window_bounds = array<i64: 8, 1>}, {pipeline_mode = #tpu.pipeline_mode<synchronous>, transform_indices = @transform_4, window_bounds = array<i64: 8, 128>}]} {
    %c0 = arith.constant 0 : index
    %c0_0 = arith.constant 0 : index
    %0 = vector.load %arg2[%c0, %c0_0] : memref<1x128xf32, #tpu.memory_space<vmem>>, vector<1x107xf32>
    %cst = arith.constant 0.000000e+00 : bf16
    %1 = vector.broadcast %cst : bf16 to vector<192x107xbf16>
    %c0_1 = arith.constant 0 : index
    %c0_2 = arith.constant 0 : index
    %2 = vector.load %arg6[%c0_1, %c0_2] : memref<192x107xbf16, #tpu.memory_space<vmem>>, vector<192x107xbf16>
    tpu.vector_store %arg6[%c0_1, %c0_2], %1 {strides = array<i32>} : memref<192x107xbf16, #tpu.memory_space<vmem>>, vector<192x107xbf16>,
    %c0_3 = arith.constant 0 : index
    %c0_4 = arith.constant 0 : index
    %3 = vector.load %arg1[%c0_3, %c0_4] : memref<24x128xbf16, #tpu.memory_space<vmem>>, vector<24x107xbf16>
    %c0_5 = arith.constant 0 : index
    %c0_6 = arith.constant 0 : index
    %4 = vector.load %arg6[%c0_5, %c0_6] : memref<192x107xbf16, #tpu.memory_space<vmem>>, vector<24x107xbf16>
    tpu.vector_store %arg6[%c0_5, %c0_6], %3 {strides = array<i32>} : memref<192x107xbf16, #tpu.memory_space<vmem>>, vector<24x107xbf16>,
    %c0_7 = arith.constant 0 : index
    %c1 = arith.constant 1 : index
    %5 = vector.load %arg1[%c0_7, %c1] : memref<24x128xbf16, #tpu.memory_space<vmem>>, vector<24x107xbf16>
    %c24 = arith.constant 24 : index
    %c0_8 = arith.constant 0 : index
    %6 = vector.load %arg6[%c24, %c0_8] : memref<192x107xbf16, #tpu.memory_space<vmem>>, vector<24x107xbf16>
    tpu.vector_store %arg6[%c24, %c0_8], %5 {strides = array<i32>} : memref<192x107xbf16, #tpu.memory_space<vmem>>, vector<24x107xbf16>,
    %c0_9 = arith.constant 0 : index
    %c4 = arith.constant 4 : index
    %7 = vector.load %arg1[%c0_9, %c4] : memref<24x128xbf16, #tpu.memory_space<vmem>>, vector<24x107xbf16>
    %c48 = arith.constant 48 : index
    %c0_10 = arith.constant 0 : index
    %8 = vector.load %arg6[%c48, %c0_10] : memref<192x107xbf16, #tpu.memory_space<vmem>>, vector<24x107xbf16>
    tpu.vector_store %arg6[%c48, %c0_10], %7 {strides = array<i32>} : memref<192x107xbf16, #tpu.memory_space<vmem>>, vector<24x107xbf16>,
    %c0_11 = arith.constant 0 : index
    %c5 = arith.constant 5 : index
    %9 = vector.load %arg1[%c0_11, %c5] : memref<24x128xbf16, #tpu.memory_space<vmem>>, vector<24x107xbf16>
    %c72 = arith.constant 72 : index
    %c0_12 = arith.constant 0 : index
    %10 = vector.load %arg6[%c72, %c0_12] : memref<192x107xbf16, #tpu.memory_space<vmem>>, vector<24x107xbf16>
    tpu.vector_store %arg6[%c72, %c0_12], %9 {strides = array<i32>} : memref<192x107xbf16, #tpu.memory_space<vmem>>, vector<24x107xbf16>,
    %c0_13 = arith.constant 0 : index
    %c16 = arith.constant 16 : index
    %11 = vector.load %arg1[%c0_13, %c16] : memref<24x128xbf16, #tpu.memory_space<vmem>>, vector<24x107xbf16>
    %c96 = arith.constant 96 : index
    %c0_14 = arith.constant 0 : index
    %12 = vector.load %arg6[%c96, %c0_14] : memref<192x107xbf16, #tpu.memory_space<vmem>>, vector<24x107xbf16>
    tpu.vector_store %arg6[%c96, %c0_14], %11 {strides = array<i32>} : memref<192x107xbf16, #tpu.memory_space<vmem>>, vector<24x107xbf16>,
    %c0_15 = arith.constant 0 : index
    %c17 = arith.constant 17 : index
    %13 = vector.load %arg1[%c0_15, %c17] : memref<24x128xbf16, #tpu.memory_space<vmem>>, vector<24x107xbf16>
    %c120 = arith.constant 120 : index
    %c0_16 = arith.constant 0 : index
    %14 = vector.load %arg6[%c120, %c0_16] : memref<192x107xbf16, #tpu.memory_space<vmem>>, vector<24x107xbf16>
    tpu.vector_store %arg6[%c120, %c0_16], %13 {strides = array<i32>} : memref<192x107xbf16, #tpu.memory_space<vmem>>, vector<24x107xbf16>,
    %c0_17 = arith.constant 0 : index
    %c20 = arith.constant 20 : index
    %15 = vector.load %arg1[%c0_17, %c20] : memref<24x128xbf16, #tpu.memory_space<vmem>>, vector<24x107xbf16>
    %c144 = arith.constant 144 : index
    %c0_18 = arith.constant 0 : index
    %16 = vector.load %arg6[%c144, %c0_18] : memref<192x107xbf16, #tpu.memory_space<vmem>>, vector<24x107xbf16>
    tpu.vector_store %arg6[%c144, %c0_18], %15 {strides = array<i32>} : memref<192x107xbf16, #tpu.memory_space<vmem>>, vector<24x107xbf16>,
    %c0_19 = arith.constant 0 : index
    %c21 = arith.constant 21 : index
    %17 = vector.load %arg1[%c0_19, %c21] : memref<24x128xbf16, #tpu.memory_space<vmem>>, vector<24x107xbf16>
    %c168 = arith.constant 168 : index
    %c0_20 = arith.constant 0 : index
    %18 = vector.load %arg6[%c168, %c0_20] : memref<192x107xbf16, #tpu.memory_space<vmem>>, vector<24x107xbf16>
    tpu.vector_store %arg6[%c168, %c0_20], %17 {strides = array<i32>} : memref<192x107xbf16, #tpu.memory_space<vmem>>, vector<24x107xbf16>,
    %c0_21 = arith.constant 0 : index
    %c0_22 = arith.constant 0 : index
    %19 = vector.load %arg3[%c0_21, %c0_22] : memref<8x192xbf16, #tpu.memory_space<vmem>>, vector<8x192xbf16>
    %c0_23 = arith.constant 0 : index
    %c0_24 = arith.constant 0 : index
    %20 = vector.load %arg6[%c0_23, %c0_24] : memref<192x107xbf16, #tpu.memory_space<vmem>>, vector<192x107xbf16>
    %cst_25 = arith.constant dense<0.000000e+00> : vector<8x107xf32>
    %21 = tpu.matmul %19, %20, %cst_25 {dimension_numbers = #tpu.dot_dimension_numbers<[1], [0], [0], [1], [0, 0, 1, 1], [], []>} : vector<8x192xbf16>, vector<192x107xbf16>, vector<8x107xf32> -> vector<8x107xf32>
    %c0_26 = arith.constant 0 : index
    %c0_27 = arith.constant 0 : index
    %22 = vector.load %arg4[%c0_26, %c0_27] : memref<8x1xf32, #tpu.memory_space<vmem>>, vector<8x1xf32>
    %23 = vector.broadcast %22 : vector<8x1xf32> to vector<8x107xf32>
    %24 = arith.addf %21, %23 : vector<8x107xf32>
    %25 = vector.broadcast %0 : vector<1x107xf32> to vector<8x107xf32>
    %26 = arith.mulf %24, %25 : vector<8x107xf32>
    %cst_28 = arith.constant 0.000000e+00 : bf16
    %27 = vector.broadcast %cst_28 : bf16 to vector<8x21xbf16>
    %c0_29 = arith.constant 0 : index
    %c107 = arith.constant 107 : index
    %28 = vector.load %arg5[%c0_29, %c107] : memref<8x128xbf16, #tpu.memory_space<vmem>>, vector<8x21xbf16>
    tpu.vector_store %arg5[%c0_29, %c107], %27 {strides = array<i32>} : memref<8x128xbf16, #tpu.memory_space<vmem>>, vector<8x21xbf16>,
    %29 = arith.truncf %26 : vector<8x107xf32> to vector<8x107xbf16>
    %c0_30 = arith.constant 0 : index
    %c0_31 = arith.constant 0 : index
    %30 = vector.load %arg5[%c0_30, %c0_31] : memref<8x128xbf16, #tpu.memory_space<vmem>>, vector<8x107xbf16>
    tpu.vector_store %arg5[%c0_30, %c0_31], %29 {strides = array<i32>} : memref<8x128xbf16, #tpu.memory_space<vmem>>, vector<8x107xbf16>,
    return
  }
  func.func @transform_0(%arg0: i32) -> (i32, i32) {
    %c0_i32 = arith.constant 0 : i32
    %c0_i32_0 = arith.constant 0 : i32
    %c0_i32_1 = arith.constant 0 : i32
    return %c0_i32, %c0_i32_0 : i32, i32
  }
  func.func @transform_1(%arg0: i32) -> (i32, i32) {
    %c0_i32 = arith.constant 0 : i32
    %c0_i32_0 = arith.constant 0 : i32
    %c0_i32_1 = arith.constant 0 : i32
    return %c0_i32, %c0_i32_0 : i32, i32
  }
  func.func @transform_2(%arg0: i32) -> (i32, i32) {
    %c0_i32 = arith.constant 0 : i32
    %c0_i32_0 = arith.constant 0 : i32
    %c0_i32_1 = arith.constant 0 : i32
    return %c0_i32, %c0_i32_0 : i32, i32
  }
  func.func @transform_3(%arg0: i32) -> (i32, i32) {
    %c0_i32 = arith.constant 0 : i32
    %c0_i32_0 = arith.constant 0 : i32
    %c0_i32_1 = arith.constant 0 : i32
    return %c0_i32, %c0_i32_0 : i32, i32
  }
  func.func @transform_4(%arg0: i32) -> (i32, i32) {
    %c0_i32 = arith.constant 0 : i32
    %c0_i32_0 = arith.constant 0 : i32
    %c0_i32_1 = arith.constant 0 : i32
    return %c0_i32, %c0_i32_0 : i32, i32
  }
}

</mosaic_0001>

<bundles_post_ra>
// kernel: tpu_custom_call.1
= control target key start
LH: loop header
LB: loop body
LE: loop exit
PB: predicated region body
PF: predicated region fallthrough
CT: control target
= control target key end

     0   :  { %9 = vsyncpa [#allocation4], 0  ;;  %s522_s0 = inlined_call_operand.hbm [shape: bf16[24,128], index: 0, kind: input, shape index: {}]   ;;  %s523_s1 = inlined_call_operand.vmem [shape: f32[1,128], index: 1, kind: input, shape index: {}]   ;;  %s524_s2 = inlined_call_operand.vmem [shape: bf16[8,192], index: 2, kind: input, shape index: {}]   ;;  %s525_s3 = inlined_call_operand.vmem [shape: f32[8,1], index: 3, kind: input, shape index: {}]   ;;  %s526_s4 = inlined_call_operand.hbm [shape: bf16[8,128], index: 4, kind: output, shape index: {}]  }
   0x1   :  { %10 = vsyncpa [#allocation5], 0  ;;  %s391_s15 = smov [#allocation3]   ;;  %s343_s19 = scalar_lea.hbm %s522_s0, 192 }
   0x2   :  { %s16_s16 = sshll.u32 %s391_s15, 4  ;;  %p344_p0 = scmp.ne.s32.totalorder %s522_s0, %s343_s19  ;;  %s17_s16 = int_to_ptr.vmem [resolvable:$true] %s16_s16 }
   0x3   :  { %p347_p1 = scmp.lt.u32.totalorder %s343_s19, %s522_s0 }
   0x5   :  { %p349_p2 = pnand %p347_p1, %p344_p0 }
   0x7   :  { %352 = shalt.err (!%p349_p2)
}
   0x8   :  { %s353_s24 = scalar_lea.vmem %s17_s16, 192  ;;  %p358_p4 = scmp.lt.s32.totalorder %s17_s16, %s17_s16 }
   0x9   :  { %p354_p3 = scmp.ne.s32.totalorder %s17_s16, %s353_s24  ;;  %p359_p5 = scmp.lt.s32.totalorder %s353_s24, %s353_s24 }
   0xb   :  { %p360_p6 = por %p359_p5, %p358_p4 }
   0xd   :  { %p361_p7 = pnand %p360_p6, %p354_p3 }
   0xf   :  { %364 = shalt.err (!%p361_p7)
}
  0x10   :  { %s392_s25 = smov 64   ;;  %s393_s26 = smov 4  }
  0x11   :  { %22 = dma.hbm_to_vmem [thread:$0]  %s522_s0, 192, %s17_s16, [#allocation4], %s392_s25, %s392_s25, %s393_s26  }
  0x12   :  { %387 = dma.done.wait [#allocation4], 192  }
  0x13   :  { %388 = vsyncadd [#allocation4], 4294967104  ;;  %vm34_vm0 = vcmask 875520   ;;  %v394_v0 = vmov 0   ;;  %v325_v1 = vld [vmem:[#allocation3] ss:$0 sps:$4 sm:$0xff]  }
  0x14   :  { %36 = vst.msk [vmem:[#allocation2 + $0x8] sm:$0xff] %vm34_vm0, %v394_v0  ;;  %35 = vst.msk [vmem:[#allocation2] sm:$0xff] %vm34_vm0, %v394_v0  ;;  %226 = vmatprep.subr.bf16.mxu0 %v394_v0  ;;  %324 = vset.pattern.permute.xlu0 %v394_v0  ;;  %v326_v2 = vld [vmem:[#allocation3 + $0x4] sm:$0xff]   ;;  %s395_s0 = smov 127   ;;  %s396_s29 = smov 124   ;;  %vm61_vm1 = vcmask 871424  }
  0x15   :  { %37 = vst.msk [vmem:[#allocation2 + $0x10] sm:$0xff] %vm34_vm0, %v394_v0  ;;  %38 = vst.msk [vmem:[#allocation2 + $0x18] sm:$0xff] %vm34_vm0, %v394_v0  ;;  %74 = vrot.lane.b32.xlu0 %v325_v1, %s395_s0  ;;  %v327_v3 = vld [vmem:[#allocation3] sm:$0xff]   ;;  %v328_v4 = vld [vmem:[#allocation3 + $0x8] ss:$0 sps:$4 sm:$0xff]   ;;  %s397_s30 = smov 123  }
  0x16   :  { %39 = vst.msk [vmem:[#allocation2 + $0x20] sm:$0xff] %vm34_vm0, %v394_v0  ;;  %40 = vst.msk [vmem:[#allocation2 + $0x28] sm:$0xff] %vm34_vm0, %v394_v0  ;;  %94 = vrot.lane.b32.xlu1 %v327_v3, %s396_s29  ;;  %v329_v5 = vld [vmem:[#allocation3] ss:$0 sps:$4 sm:$0xff]   ;;  %v330_v6 = vld [vmem:[#allocation3 + $0x4] sm:$0xff]   ;;  %s398_s5 = smov 112  }
  0x17   :  { %41 = vst.msk [vmem:[#allocation2 + $0x30] sm:$0xff] %vm34_vm0, %v394_v0  ;;  %42 = vst.msk [vmem:[#allocation2 + $0x38] sm:$0xff] %vm34_vm0, %v394_v0  ;;  %v331_v7 = vld [vmem:[#allocation3] sm:$0xff]   ;;  %v332_v8 = vld [vmem:[#allocation3 + $0x8] ss:$0 sps:$4 sm:$0xff]   ;;  %s399_s6 = smov 111  }
  0x18   :  { %43 = vst.msk [vmem:[#allocation2 + $0x40] sm:$0xff] %vm34_vm0, %v394_v0  ;;  %44 = vst.msk [vmem:[#allocation2 + $0x48] sm:$0xff] %vm34_vm0, %v394_v0  ;;  %v339_v9 = vld [vmem:[#allocation3 + $0x8] ss:$0 sps:$4 sm:$0xff]   ;;  %v340_v10 = vld [vmem:[#allocation3] sm:$0xff]   ;;  %s400_s7 = smov 108  }
  0x19   :  { %45 = vst.msk [vmem:[#allocation2 + $0x50] sm:$0xff] %vm34_vm0, %v394_v0  ;;  %46 = vst.msk [vmem:[#allocation2 + $0x58] sm:$0xff] %vm34_vm0, %v394_v0  ;;  %76 = vrot.lane.b32.xlu0 %v326_v2, %s395_s0  ;;  %v333_v11 = vld [vmem:[#allocation3] ss:$0 sps:$4 sm:$0xff]   ;;  %v334_v12 = vld [vmem:[#allocation3 + $0x4] sm:$0xff]   ;;  %s401_s8 = smov 107  }
  0x1a   :  { %96 = vrot.lane.b32.xlu1 %v328_v4, %s396_s29  ;;  %62 = vst.msk [vmem:[#allocation2 + $0x8] sm:$0xf] %vm61_vm1, %v339_v9  ;;  %v335_v13 = vld [vmem:[#allocation3] sm:$0xff]   ;;  %v336_v14 = vld [vmem:[#allocation3 + $0x8] ss:$0 sps:$4 sm:$0xff]   ;;  %vm222_vm2 = vcmask 523264  }
  0x1b   :  { %60 = vst.msk [vmem:[#allocation2] sm:$0xff] %vm34_vm0, %v340_v10  ;;  %v337_v15 = vld [vmem:[#allocation3] ss:$0 sps:$4 sm:$0xff]   ;;  %v338_v17 = vld [vmem:[#allocation3 + $0x4] sm:$0xff]   ;;  %vm80_vm3 = vcmask 875524   ;;  %vm273_vm4 = vcmask 1044312  }
  0x1c   :  { %v472_v18 = vld [vmem:[%s524_s2] sm:$0xff]  ;;  %274 = vst.msk [vmem:[#allocation6] sm:$0xf] %vm273_vm4, %v394_v0  ;;  %s402_s13 = smov [#allocation6]  }
  0x1d   :  { %113 = vrot.lane.b32.xlu0 %v329_v5, %s397_s30  ;;  %v309_v19 = vcombine.high %v472_v18, %v472_v18  ;;  %v210_v20 = vld [vmem:[%s525_s3] sm:$0xff]  ;;  %v308_v46 = vcombine.low %v472_v18, %v472_v18  ;;  %s283_s14 = sshll.u32 %s402_s13, 4  ;;  %s284_s14 = int_to_ptr.vmem [resolvable:$true] %s283_s14 }
  0x1e   :  { %115 = vrot.lane.b32.xlu1 %v330_v6, %s397_s30  ;;  %v311_v48 = vld [vmem:[%s523_s1] ss:$0 sm:$0xff]  ;;  %s365_s15 = scalar_lea.vmem %s284_s14, 64  ;;  %p370_p9 = scmp.lt.s32.totalorder %s284_s14, %s284_s14 }
  0x1f   :  { %310 = vmatprep.mubr.msk.bf16.mxu0 %vm222_vm2, %v309_v19  ;;  %p366_p8 = scmp.ne.s32.totalorder %s284_s14, %s365_s15  ;;  %p371_p10 = scmp.lt.s32.totalorder %s365_s15, %s365_s15 }
  0x21   :  { %132 = vrot.lane.b32.xlu0 %v331_v7, %s398_s5  ;;  %p372_p11 = por %p371_p10, %p370_p9 }
  0x22   :  { %134 = vrot.lane.b32.xlu1 %v332_v8, %s398_s5  ;;  %v198_v16 = vld [vmem:[#allocation2] sm:$0xff] }
  0x23   :  { %227 = vmatpush1.bf16.msra.mxu0 %v198_v16  ;;  %p373_p12 = pnand %p372_p11, %p366_p8 }
  0x24   :  { %228 = vmatprep.subr.bf16.mxu0 %v394_v0 }
  0x25   :  { %151 = vrot.lane.b32.xlu0 %v333_v11, %s399_s6 }
  0x26   :  { %153 = vrot.lane.b32.xlu1 %v334_v12, %s399_s6 }
  0x29   :  { %170 = vrot.lane.b32.xlu0 %v335_v13, %s400_s7 }
  0x2a   :  { %172 = vrot.lane.b32.xlu1 %v336_v14, %s400_s7 }
  0x2d   :  { %189 = vrot.lane.b32.xlu0 %v337_v15, %s401_s8 }
  0x2e   :  { %191 = vrot.lane.b32.xlu1 %v338_v17, %s401_s8 }
  0x31   :  { %213 = vperm.xlu0 %324, %v210_v20  }
  0x87   :  { %v75_v21 = vpop.permute.xlu0 %74 }
  0x88   :  { %81 = vst.msk [vmem:[#allocation2 + $0x8] sm:$0xf0] %vm80_vm3, %v75_v21  ;;  %v95_v22 = vpop.permute.xlu1 %94 }
  0x89   :  { %100 = vst.msk [vmem:[#allocation2 + $0x18] sm:$0xff] %vm34_vm0, %v95_v22 }
  0x8b   :  { %v77_v23 = vpop.permute.xlu0 %76 }
  0x8c   :  { %82 = vst.msk [vmem:[#allocation2 + $0x10] sm:$0xff] %vm34_vm0, %v77_v23  ;;  %v97_v24 = vpop.permute.xlu1 %96 }
  0x8d   :  { %101 = vst.msk [vmem:[#allocation2 + $0x20] sm:$0xf] %vm61_vm1, %v97_v24 }
  0x8f   :  { %v199_v25 = vld [vmem:[#allocation2 + $0x8] sm:$0xff]  ;;  %v114_v26 = vpop.permute.xlu0 %113 }
  0x90   :  { %229 = vmatpush1.bf16.msra.mxu0 %v199_v25  ;;  %119 = vst.msk [vmem:[#allocation2 + $0x20] sm:$0xf0] %vm80_vm3, %v114_v26  ;;  %v116_v27 = vpop.permute.xlu1 %115  ;;  %v201_v30 = vld [vmem:[#allocation2 + $0x18] sm:$0xff] }
  0x91   :  { %230 = vmatprep.subr.bf16.mxu0 %v394_v0  ;;  %120 = vst.msk [vmem:[#allocation2 + $0x28] sm:$0xff] %vm34_vm0, %v116_v27 }
  0x93   :  { %v200_v28 = vld [vmem:[#allocation2 + $0x10] sm:$0xff]  ;;  %v133_v29 = vpop.permute.xlu0 %132 }
  0x94   :  { %231 = vmatpush1.bf16.msra.mxu0 %v200_v28  ;;  %138 = vst.msk [vmem:[#allocation2 + $0x30] sm:$0xff] %vm34_vm0, %v133_v29  ;;  %v135_v31 = vpop.permute.xlu1 %134 }
  0x95   :  { %232 = vmatprep.subr.bf16.mxu0 %v394_v0  ;;  %139 = vst.msk [vmem:[#allocation2 + $0x38] sm:$0xf] %vm61_vm1, %v135_v31 }
  0x97   :  { %v152_v32 = vpop.permute.xlu0 %151  ;;  %v202_v33 = vld [vmem:[#allocation2 + $0x20] sm:$0xff] }
  0x98   :  { %233 = vmatpush1.bf16.msra.mxu0 %v201_v30  ;;  %157 = vst.msk [vmem:[#allocation2 + $0x38] sm:$0xf0] %vm80_vm3, %v152_v32  ;;  %v154_v34 = vpop.permute.xlu1 %153  ;;  %v203_v36 = vld [vmem:[#allocation2 + $0x28] sm:$0xff] }
  0x99   :  { %234 = vmatprep.subr.bf16.mxu0 %v394_v0  ;;  %158 = vst.msk [vmem:[#allocation2 + $0x40] sm:$0xff] %vm34_vm0, %v154_v34 }
  0x9b   :  { %v171_v35 = vpop.permute.xlu0 %170  ;;  %v204_v39 = vld [vmem:[#allocation2 + $0x30] sm:$0xff] }
  0x9c   :  { %235 = vmatpush1.bf16.msra.mxu0 %v202_v33  ;;  %176 = vst.msk [vmem:[#allocation2 + $0x48] sm:$0xff] %vm34_vm0, %v171_v35  ;;  %v173_v37 = vpop.permute.xlu1 %172 }
  0x9d   :  { %236 = vmatprep.subr.bf16.mxu0 %v394_v0  ;;  %177 = vst.msk [vmem:[#allocation2 + $0x50] sm:$0xf] %vm61_vm1, %v173_v37 }
  0x9f   :  { %v190_v38 = vpop.permute.xlu0 %189  ;;  %v205_v41 = vld [vmem:[#allocation2 + $0x38] sm:$0xff] }
  0xa0   :  { %237 = vmatpush1.bf16.msra.mxu0 %v203_v36  ;;  %195 = vst.msk [vmem:[#allocation2 + $0x50] sm:$0xf0] %vm80_vm3, %v190_v38  ;;  %v192_v40 = vpop.permute.xlu1 %191  ;;  %v206_v42 = vld [vmem:[#allocation2 + $0x40] sm:$0xff] }
  0xa1   :  { %238 = vmatprep.subr.bf16.mxu0 %v394_v0  ;;  %196 = vst.msk [vmem:[#allocation2 + $0x58] sm:$0xff] %vm34_vm0, %v192_v40 }
  0xa3   :  { %v207_v43 = vld [vmem:[#allocation2 + $0x48] sm:$0xff] }
  0xa4   :  { %239 = vmatpush1.bf16.msra.mxu0 %v204_v39 }
  0xa5   :  { %240 = vmatprep.subr.bf16.mxu0 %v394_v0 }
  0xa7   :  { %v208_v44 = vld [vmem:[#allocation2 + $0x50] sm:$0xff] }
  0xa8   :  { %241 = vmatpush1.bf16.msra.mxu0 %v205_v41  ;;  %v209_v45 = vld [vmem:[#allocation2 + $0x58] sm:$0xff] }
  0xa9   :  { %242 = vmatprep.subr.bf16.mxu0 %v394_v0 }
  0xac   :  { %243 = vmatpush1.bf16.msra.mxu0 %v206_v42 }
  0xad   :  { %244 = vmatprep.subr.bf16.mxu0 %v394_v0 }
  0xb0   :  { %245 = vmatpush1.bf16.msra.mxu0 %v207_v43  ;;  %v214_v47 = vpop.permute.xlu0 %213 }
  0xb1   :  { %246 = vmatprep.subr.bf16.mxu0 %v394_v0 }
  0xb4   :  { %247 = vmatpush1.bf16.msra.mxu0 %v208_v44 }
  0xb5   :  { %248 = vmatprep.subr.bf16.mxu0 %v394_v0 }
  0xb8   :  { %249 = vmatpush1.bf16.msra.mxu0 %v209_v45 }
  0xbb   :  { %259 = vmatmul.mubr.bf16.vlgmr.msra.gmra.mrb[0].mxu0 %v308_v46 }
 0x18e   :  { %v260_v49 = vpop.f32.mrb[0].mxu0 }
 0x18f   :  { %v261_v50 = vadd.f32 %v260_v49, %v214_v47  ;;  %v262_v51 = vpop.f32.mrb[1].mxu0 }
 0x190   :  { %v263_v52 = vpop.f32.mrb[2].mxu0 }
 0x191   :  { %v272_v53 = vmul.f32 %v311_v48, %v261_v50  ;;  %v264_v54 = vpop.f32.mrb[3].mxu0 }
 0x193   :  { %v275_v55 = vpack.c.bf16 %v272_v53, %v272_v53 }
 0x195   :  { %276 = vst.msk [vmem:[#allocation6] sm:$0xf] %vm61_vm1, %v275_v55 }
 0x196   :  { %376 = shalt.err (!%p373_p12)
}
 0x197   :  { %s377_s17 = scalar_lea.hbm %s526_s4, 64 }
 0x198   :  { %p378_p13 = scmp.ne.s32.totalorder %s526_s4, %s377_s17  ;;  %p381_p0 = scmp.lt.u32.totalorder %s377_s17, %s526_s4 }
 0x19a   :  { %p383_p1 = pnand %p381_p0, %p378_p13 }
 0x19c   :  { %386 = shalt.err (!%p383_p1)
}
 0x19d   :  { %286 = dma.vmem_to_hbm [thread:$0]  %s284_s14, 64, %s526_s4, [#allocation5]  }
 0x19e   :  { %389 = dma.done.wait [#allocation5], 64  }
 0x19f   :  { %390 = vsyncadd [#allocation5], 4294967232 }
 0x1a0   :  { %290 = vsyncpa [#allocation4], 1 }
 0x1a1   :  { %291 = vsyncpa [#allocation5], 1 }

</bundles_post_ra>
